<compile_context>
chip_gen: v6e
topology: v6e:2x2x1
jax: 0.10.0
libtpu: 0.0.40
codegen_flags: <defaults>
</compile_context>

<pallas_src>
import functools

import numpy as np
import jax
import jax.numpy as jnp
from jax.experimental import pallas as pl
from jax.experimental.pallas import tpu as pltpu


def _round_up(x, m):
    return ((x + m - 1) // m) * m


_LARGE_BATCH = 512    # above this, switch to the batch-tiled grid path
_BATCH_TILE = 256     # batch tile for the grid path


# --------------------------------------------------------------------------
# One fused kernel: chained (matmul + bias + ReLU) layers, then per-output
# slice + (softmax | identity) epilogue written straight to the output refs.
# --------------------------------------------------------------------------
def _fused_classifier_kernel(x_ref, w0_ref, wstack_ref, bstack_ref, *out_refs,
                             n_layers, slice_bounds, softmax_flags):
    # Layer 0: unpadded input width K, weight (K, P).
    h = jnp.dot(x_ref[...], w0_ref[...], preferred_element_type=jnp.float32)
    h = h + bstack_ref[0]
    if n_layers > 1:                       # make_fc drops the trailing ReLU
        h = jnp.maximum(h, 0.0)

    # Hidden / output layers from the stacked weights (static unroll).
    for li in range(1, n_layers):
        h = jnp.dot(h, wstack_ref[li - 1], preferred_element_type=jnp.float32)
        h = h + bstack_ref[li]
        if li < n_layers - 1:
            h = jnp.maximum(h, 0.0)

    # Fused epilogue: output splitting + transform.
    for i, (start, stop) in enumerate(slice_bounds):
        sl = h[:, start:stop]
        if softmax_flags[i]:
            m = jnp.max(sl, axis=-1, keepdims=True)
            e = jnp.exp(sl - m)                      # EUP slot (free here)
            sl = e / jnp.sum(e, axis=-1, keepdims=True)
        out_refs[i][...] = sl.astype(out_refs[i].dtype)


def fused_classifier_forward(z, w0, wstack, bstack, output_dims, softmax_flags,
                             vmem_limit_bytes):
    """z:(B,K) unpadded -> tuple of (B, d_i) outputs, all in one pallas_call."""
    n_layers = bstack.shape[0]
    B, K = z.shape

    bounds, off = [], 0
    for d in output_dims:
        bounds.append((off, off + d))
        off += d

    kernel = functools.partial(
        _fused_classifier_kernel,
        n_layers=n_layers,
        slice_bounds=tuple(bounds),
        softmax_flags=tuple(bool(f) for f in softmax_flags),
    )

    if B <= _LARGE_BATCH:
        # No grid: single invocation, everything resident in VMEM once
        # (no double-buffering of the constant weights).
        vmem_spec = pl.BlockSpec(memory_space=pltpu.MemorySpace.VMEM)
        out_shape = tuple(jax.ShapeDtypeStruct((B, d), jnp.float32)
                          for d in output_dims)
        return pl.pallas_call(
            kernel,
            out_shape=out_shape,
            in_specs=[vmem_spec, vmem_spec, vmem_spec, vmem_spec],
            out_specs=tuple(vmem_spec for _ in output_dims),
            compiler_params=pltpu.CompilerParams(
                vmem_limit_bytes=vmem_limit_bytes),
        )(z, w0, wstack, bstack)

    # Large-batch path: tile the batch; "parallel" lets v7x shard tiles
    # across its two TensorCores. Weights are broadcast (constant index_map).
    TB = _BATCH_TILE
    B_pad = _round_up(B, TB)
    if B_pad != B:
        z = jnp.pad(z, ((0, B_pad - B), (0, 0)))
    nb = B_pad // TB
    out_shape = tuple(jax.ShapeDtypeStruct((B_pad, d), jnp.float32)
                      for d in output_dims)
    outs = pl.pallas_call(
        kernel,
        out_shape=out_shape,
        grid=(nb,),
        in_specs=[
            pl.BlockSpec((TB, K), lambda i: (i, 0)),
            pl.BlockSpec(w0.shape, lambda i: (0, 0)),
            pl.BlockSpec(wstack.shape, lambda i: (0, 0, 0)),
            pl.BlockSpec(bstack.shape, lambda i: (0, 0, 0)),
        ],
        out_specs=tuple(pl.BlockSpec((TB, d), lambda i: (i, 0))
                        for d in output_dims),
        compiler_params=pltpu.CompilerParams(
            dimension_semantics=("parallel",),
            vmem_limit_bytes=vmem_limit_bytes),
    )(z, w0, wstack, bstack)
    if B_pad != B:
        outs = tuple(o[:B] for o in outs)
    return outs


# --------------------------------------------------------------------------
# Classifier (JAX port; forward hot path is one fused Pallas kernel)
# --------------------------------------------------------------------------
class Classifier:
    """Simple FFNN with output splitting (fully fused Pallas forward)."""

    BN_EPS = 1e-5
    LANE = 128
    SUBLANE = 8

    def __init__(self, key, num_latent, outputs, hidden_dims=(64, 64, 64)):
        self.output_dim = [o[0] for o in outputs]
        self.output_transform = [o[1] for o in outputs]
        self.cumsums = np.cumsum(self.output_dim)
        self.cumsums = np.insert(self.cumsums, 0, 0)
        self.dims = [num_latent] + list(hidden_dims) + [int(self.cumsums[-1])]
        self.total_out = int(self.cumsums[-1])

        # Which transforms can be fused in-kernel (softmax / None); anything
        # else is a generic callable applied in plain JAX after the kernel.
        self.fused_softmax = []
        self.post_transforms = []
        for t in self.output_transform:
            if t is None:
                self.fused_softmax.append(False)
                self.post_transforms.append(None)
            elif (isinstance(t, str) and t.lower() == "softmax") or t is jax.nn.softmax:
                self.fused_softmax.append(True)
                self.post_transforms.append(None)
            else:
                self.fused_softmax.append(False)
                self.post_transforms.append(t)

        # Deterministic parameter init (PyTorch-style uniform Linear, fixed
        # randomized eval-mode BatchNorm stats/affine so the fold is nontrivial).
        self.layers = []
        for in_dim, out_dim in zip(self.dims[:-1], self.dims[1:]):
            key, kw, kb, kg, kbt, km, kv = jax.random.split(key, 7)
            bound = 1.0 / np.sqrt(in_dim)
            w = jax.random.uniform(kw, (in_dim, out_dim), jnp.float32,
                                   -bound, bound)
            b = jax.random.uniform(kb, (out_dim,), jnp.float32, -bound, bound)
            gamma = 1.0 + 0.1 * jax.random.normal(kg, (out_dim,), jnp.float32)
            beta = 0.1 * jax.random.normal(kbt, (out_dim,), jnp.float32)
            r_mean = 0.1 * jax.random.normal(km, (out_dim,), jnp.float32)
            r_var = 1.0 + 0.1 * jax.random.uniform(kv, (out_dim,), jnp.float32)
            self.layers.append(dict(w=w, b=b, gamma=gamma, beta=beta,
                                    mean=r_mean, var=r_var))

        # ---- Fold eval-mode BN into the Linear weights ONCE and build the
        # ---- packed operands: w0 (K, P), wstack (L-1, P, P), bstack (L, 1, P).
        n_layers = len(self.layers)
        P = max(_round_up(d, self.LANE) for d in self.dims[1:])
        self.p_max = P

        w0 = jnp.zeros((self.dims[0], P), jnp.float32)
        wstack = jnp.zeros((max(n_layers - 1, 1), P, P), jnp.float32)
        bstack = jnp.zeros((n_layers, 1, P), jnp.float32)
        for li, layer in enumerate(self.layers):
            in_dim, out_dim = self.dims[li], self.dims[li + 1]
            scale = layer["gamma"] * jax.lax.rsqrt(layer["var"] + self.BN_EPS)
            w_f = layer["w"] * scale[None, :]
            b_f = (layer["b"] - layer["mean"]) * scale + layer["beta"]
            if li == 0:
                w0 = w0.at[:in_dim, :out_dim].set(w_f)
            else:
                wstack = wstack.at[li - 1, :in_dim, :out_dim].set(w_f)
            bstack = bstack.at[li, 0, :out_dim].set(b_f)
        self.w0, self.wstack, self.bstack = w0, wstack, bstack

        # Explicit VMEM budget (headroom, capped v7x-safe at 64 MiB).
        param_bytes = 4 * (w0.size + wstack.size + bstack.size)
        act_bytes = 4 * _BATCH_TILE * (self.dims[0] + 2 * P + self.total_out)
        self.vmem_limit_bytes = int(
            min(64 << 20, max(4 * (param_bytes + act_bytes), 16 << 20)))

        self._forward_jit = jax.jit(self._forward_impl)

    # ------------------------------------------------------------------
    def _forward_impl(self, z):
        if z.dtype != jnp.float32:
            z = z.astype(jnp.float32)
        outs = fused_classifier_forward(
            z, self.w0, self.wstack, self.bstack,
            self.output_dim, self.fused_softmax, self.vmem_limit_bytes)
        # Generic user callables (not softmax/None) applied outside the kernel.
        final = []
        for o, t in zip(outs, self.post_transforms):
            final.append(o if t is None else t(o))
        return tuple(final)

    def forward(self, z):
        return list(self._forward_jit(z))

    # ------------------------------------------------------------------
    # pure-JAX reference (unfolded BN, unpadded, HIGHEST matmul precision)
    def forward_ref(self, z):
        x = z.astype(jnp.float32)
        n_layers = len(self.layers)
        for li, layer in enumerate(self.layers):
            scale = layer["gamma"] * jax.lax.rsqrt(layer["var"] + self.BN_EPS)
            shift = layer["beta"] - layer["mean"] * scale
            x = jnp.dot(x, layer["w"],
                        precision=jax.lax.Precision.HIGHEST) + layer["b"][None, :]
            x = x * scale[None, :] + shift[None, :]
            if li < (n_layers - 1):
                x = jnp.maximum(x, 0.0)
        outs = []
        for i in range(len(self.cumsums) - 1):
            sl = x[:, int(self.cumsums[i]):int(self.cumsums[i + 1])]
            t = self.output_transform[i]
            if t is None:
                outs.append(sl)
            elif isinstance(t, str) and t.lower() == "softmax":
                outs.append(jax.nn.softmax(sl, axis=-1))
            else:
                outs.append(t(sl))
        return outs


# --------------------------------------------------------------------------
if __name__ == "__main__":
    key = jax.random.PRNGKey(0)
    kp, kz = jax.random.split(key)

    batch = 2
    num_latent = 32
    hidden_dims = (64, 64, 64)
    # outputs: list of (dim, transform) like the PyTorch module; "softmax" and
    # None are fused in-kernel, any other callable falls back to plain JAX.
    outputs = [
        (8, "softmax"),
        (8, None),
    ]

    clf = Classifier(kp, num_latent, outputs, hidden_dims=hidden_dims)

    z = jax.random.normal(kz, (batch, num_latent), jnp.float32)

    result = clf.forward(z)
    result = jax.block_until_ready(result)

    # sanity check against pure-JAX reference
    ref = clf.forward_ref(z)
    for got, want in zip(result, ref):
        np.testing.assert_allclose(np.asarray(got), np.asarray(want),
                                   rtol=1e-5, atol=1e-5)

    print("KERNEL_OK")
</pallas_src>

<mosaic_0001>
module attributes {stable_mosaic.version = 11 : i64} {
  func.func @_fused_classifier_kernel(%arg0: memref<2x32xf32, #tpu.memory_space<vmem>>, %arg1: memref<32x128xf32, #tpu.memory_space<vmem>>, %arg2: memref<3x128x128xf32, #tpu.memory_space<vmem>>, %arg3: memref<4x1x128xf32, #tpu.memory_space<vmem>>, %arg4: memref<2x8xf32, #tpu.memory_space<vmem>>, %arg5: memref<2x8xf32, #tpu.memory_space<vmem>>) attributes {dimension_semantics = [], scalar_prefetch = 0 : i64, scratch_operands = 0 : i64, tpu.core_type = #tpu.core_type<tc>} {
    %c0 = arith.constant 0 : index
    %c0_0 = arith.constant 0 : index
    %0 = vector.load %arg0[%c0, %c0_0] : memref<2x32xf32, #tpu.memory_space<vmem>>, vector<2x32xf32>
    %c0_1 = arith.constant 0 : index
    %c0_2 = arith.constant 0 : index
    %1 = vector.load %arg1[%c0_1, %c0_2] : memref<32x128xf32, #tpu.memory_space<vmem>>, vector<32x128xf32>
    %cst = arith.constant dense<0.000000e+00> : vector<2x128xf32>
    %2 = tpu.matmul %0, %1, %cst {dimension_numbers = #tpu.dot_dimension_numbers<[1], [0], [0], [1], [0, 0, 1, 1], [], []>} : vector<2x32xf32>, vector<32x128xf32>, vector<2x128xf32> -> vector<2x128xf32>
    %c0_3 = arith.constant 0 : index
    %c0_4 = arith.constant 0 : index
    %c0_5 = arith.constant 0 : index
    %3 = vector.load %arg3[%c0_3, %c0_4, %c0_5] : memref<4x1x128xf32, #tpu.memory_space<vmem>>, vector<1x1x128xf32>
    %4 = vector.shape_cast %3 : vector<1x1x128xf32> to vector<1x128xf32>
    %5 = vector.broadcast %4 : vector<1x128xf32> to vector<2x128xf32>
    %6 = arith.addf %2, %5 : vector<2x128xf32>
    %cst_6 = arith.constant 0.000000e+00 : f32
    %7 = vector.broadcast %cst_6 : f32 to vector<2x128xf32>
    %8 = arith.maximumf %6, %7 : vector<2x128xf32>
    %c0_7 = arith.constant 0 : index
    %c0_8 = arith.constant 0 : index
    %c0_9 = arith.constant 0 : index
    %9 = vector.load %arg2[%c0_7, %c0_8, %c0_9] : memref<3x128x128xf32, #tpu.memory_space<vmem>>, vector<1x128x128xf32>
    %10 = vector.shape_cast %9 : vector<1x128x128xf32> to vector<128x128xf32>
    %cst_10 = arith.constant dense<0.000000e+00> : vector<2x128xf32>
    %11 = tpu.matmul %8, %10, %cst_10 {dimension_numbers = #tpu.dot_dimension_numbers<[1], [0], [0], [1], [0, 0, 1, 1], [], []>} : vector<2x128xf32>, vector<128x128xf32>, vector<2x128xf32> -> vector<2x128xf32>
    %c1 = arith.constant 1 : index
    %c0_11 = arith.constant 0 : index
    %c0_12 = arith.constant 0 : index
    %12 = vector.load %arg3[%c1, %c0_11, %c0_12] : memref<4x1x128xf32, #tpu.memory_space<vmem>>, vector<1x1x128xf32>
    %13 = vector.shape_cast %12 : vector<1x1x128xf32> to vector<1x128xf32>
    %14 = vector.broadcast %13 : vector<1x128xf32> to vector<2x128xf32>
    %15 = arith.addf %11, %14 : vector<2x128xf32>
    %cst_13 = arith.constant 0.000000e+00 : f32
    %16 = vector.broadcast %cst_13 : f32 to vector<2x128xf32>
    %17 = arith.maximumf %15, %16 : vector<2x128xf32>
    %c1_14 = arith.constant 1 : index
    %c0_15 = arith.constant 0 : index
    %c0_16 = arith.constant 0 : index
    %18 = vector.load %arg2[%c1_14, %c0_15, %c0_16] : memref<3x128x128xf32, #tpu.memory_space<vmem>>, vector<1x128x128xf32>
    %19 = vector.shape_cast %18 : vector<1x128x128xf32> to vector<128x128xf32>
    %cst_17 = arith.constant dense<0.000000e+00> : vector<2x128xf32>
    %20 = tpu.matmul %17, %19, %cst_17 {dimension_numbers = #tpu.dot_dimension_numbers<[1], [0], [0], [1], [0, 0, 1, 1], [], []>} : vector<2x128xf32>, vector<128x128xf32>, vector<2x128xf32> -> vector<2x128xf32>
    %c2 = arith.constant 2 : index
    %c0_18 = arith.constant 0 : index
    %c0_19 = arith.constant 0 : index
    %21 = vector.load %arg3[%c2, %c0_18, %c0_19] : memref<4x1x128xf32, #tpu.memory_space<vmem>>, vector<1x1x128xf32>
    %22 = vector.shape_cast %21 : vector<1x1x128xf32> to vector<1x128xf32>
    %23 = vector.broadcast %22 : vector<1x128xf32> to vector<2x128xf32>
    %24 = arith.addf %20, %23 : vector<2x128xf32>
    %cst_20 = arith.constant 0.000000e+00 : f32
    %25 = vector.broadcast %cst_20 : f32 to vector<2x128xf32>
    %26 = arith.maximumf %24, %25 : vector<2x128xf32>
    %c2_21 = arith.constant 2 : index
    %c0_22 = arith.constant 0 : index
    %c0_23 = arith.constant 0 : index
    %27 = vector.load %arg2[%c2_21, %c0_22, %c0_23] : memref<3x128x128xf32, #tpu.memory_space<vmem>>, vector<1x128x128xf32>
    %28 = vector.shape_cast %27 : vector<1x128x128xf32> to vector<128x128xf32>
    %cst_24 = arith.constant dense<0.000000e+00> : vector<2x128xf32>
    %29 = tpu.matmul %26, %28, %cst_24 {dimension_numbers = #tpu.dot_dimension_numbers<[1], [0], [0], [1], [0, 0, 1, 1], [], []>} : vector<2x128xf32>, vector<128x128xf32>, vector<2x128xf32> -> vector<2x128xf32>
    %c3 = arith.constant 3 : index
    %c0_25 = arith.constant 0 : index
    %c0_26 = arith.constant 0 : index
    %30 = vector.load %arg3[%c3, %c0_25, %c0_26] : memref<4x1x128xf32, #tpu.memory_space<vmem>>, vector<1x1x128xf32>
    %31 = vector.shape_cast %30 : vector<1x1x128xf32> to vector<1x128xf32>
    %32 = vector.broadcast %31 : vector<1x128xf32> to vector<2x128xf32>
    %33 = arith.addf %29, %32 : vector<2x128xf32>
    %34 = vector.extract_strided_slice %33 {offsets = [0, 0], sizes = [2, 8], strides = [1, 1]} : vector<2x128xf32> to vector<2x8xf32>
    %cst_27 = arith.constant dense<0xFF800000> : vector<2xf32>
    %35 = vector.multi_reduction <maximumf>, %34, %cst_27 [1] : vector<2x8xf32> to vector<2xf32>
    %36 = vector.shape_cast %35 : vector<2xf32> to vector<2x1xf32>
    %37 = vector.broadcast %36 : vector<2x1xf32> to vector<2x8xf32>
    %38 = arith.subf %34, %37 : vector<2x8xf32>
    %39 = math.exp %38 : vector<2x8xf32>
    %cst_28 = arith.constant dense<0.000000e+00> : vector<2xf32>
    %40 = vector.multi_reduction <add>, %39, %cst_28 [1] : vector<2x8xf32> to vector<2xf32>
    %41 = vector.shape_cast %40 : vector<2xf32> to vector<2x1xf32>
    %42 = vector.broadcast %41 : vector<2x1xf32> to vector<2x8xf32>
    %43 = arith.divf %39, %42 : vector<2x8xf32>
    %c0_29 = arith.constant 0 : index
    %c0_30 = arith.constant 0 : index
    %44 = vector.load %arg4[%c0_29, %c0_30] : memref<2x8xf32, #tpu.memory_space<vmem>>, vector<2x8xf32>
    tpu.vector_store %arg4[%c0_29, %c0_30], %43 {strides = array<i32>} : memref<2x8xf32, #tpu.memory_space<vmem>>, vector<2x8xf32>,
    %45 = vector.extract_strided_slice %33 {offsets = [0, 8], sizes = [2, 8], strides = [1, 1]} : vector<2x128xf32> to vector<2x8xf32>
    %c0_31 = arith.constant 0 : index
    %c0_32 = arith.constant 0 : index
    %46 = vector.load %arg5[%c0_31, %c0_32] : memref<2x8xf32, #tpu.memory_space<vmem>>, vector<2x8xf32>
    tpu.vector_store %arg5[%c0_31, %c0_32], %45 {strides = array<i32>} : memref<2x8xf32, #tpu.memory_space<vmem>>, vector<2x8xf32>,
    return
  }
}

</mosaic_0001>

<bundles_post_ra>
// kernel: _forward_impl.1
= control target key start
LH: loop header
LB: loop body
LE: loop exit
PB: predicated region body
PF: predicated region fallthrough
CT: control target
= control target key end

     0   :  { %11 = vsyncpa [#allocation3], 0  ;;  %s914_s0 = inlined_call_operand.hbm [shape: f32[2,32], index: 0, kind: input, shape index: {}]   ;;  %s915_s1 = inlined_call_operand.hbm [shape: f32[32,128], index: 1, kind: input, shape index: {}]   ;;  %s916_s2 = inlined_call_operand.hbm [shape: f32[3,128,128], index: 2, kind: input, shape index: {}]   ;;  %s917_s3 = inlined_call_operand.vmem [shape: f32[4,1,128], index: 3, kind: input, shape index: {}]   ;;  %s918_s4 = inlined_call_operand.hbm [shape: f32[2,8], index: 4, kind: output, shape index: {0}]   ;;  %s919_s5 = inlined_call_operand.hbm [shape: f32[2,8], index: 5, kind: output, shape index: {1}]  }
   0x1   :  { %12 = vsyncpa [#allocation6], 0 }
   0x2   :  { %13 = vsyncpa [#allocation4], 0 }
   0x3   :  { %14 = vsyncpa [#allocation10], 0  ;;  %s783_s18 = smov [#allocation5]  }
   0x4   :  { %s30_s19 = sshll.u32 %s783_s18, 4  ;;  %s31_s19 = int_to_ptr.vmem [resolvable:$true] %s30_s19 }
   0x5   :  { %s683_s20 = scalar_lea.vmem %s31_s19, 512  ;;  %p688_p1 = scmp.lt.s32.totalorder %s31_s19, %s31_s19 }
   0x6   :  { %p684_p0 = scmp.ne.s32.totalorder %s31_s19, %s683_s20  ;;  %p689_p2 = scmp.lt.s32.totalorder %s683_s20, %s683_s20 }
   0x8   :  { %p690_p3 = por %p689_p2, %p688_p1 }
   0xa   :  { %p691_p4 = pnand %p690_p3, %p684_p0 }
   0xc   :  { %694 = shalt.err (!%p691_p4)
}
   0xd   :  { %s784_s21 = smov 128   ;;  %s785_s22 = smov 8  }
   0xe   :  { %36 = dma.hbm_to_vmem [thread:$0]  %s915_s1, 512, %s31_s19, [#allocation6], %s784_s21, %s784_s21, %s785_s22  }
   0xf   :  { %s786_s25 = smov [#allocation2]   ;;  %s787_s27 = smov [#allocation7]  }
  0x10   :  { %s21_s26 = sshll.u32 %s786_s25, 4  ;;  %s42_s28 = sshll.u32 %s787_s27, 4  ;;  %s22_s26 = int_to_ptr.vmem [resolvable:$true] %s21_s26  ;;  %s43_s28 = int_to_ptr.vmem [resolvable:$true] %s42_s28 }
  0x11   :  { %s703_s29 = scalar_lea.vmem %s22_s26, 32  ;;  %p708_p6 = scmp.lt.s32.totalorder %s22_s26, %s22_s26 }
  0x12   :  { %p704_p5 = scmp.ne.s32.totalorder %s22_s26, %s703_s29  ;;  %p709_p7 = scmp.lt.s32.totalorder %s703_s29, %s703_s29 }
  0x14   :  { %p710_p8 = por %p709_p7, %p708_p6 }
  0x16   :  { %p711_p9 = pnand %p710_p8, %p704_p5 }
  0x18   :  { %714 = shalt.err (!%p711_p9)
}
  0x19   :  { %24 = dma.hbm_to_vmem [thread:$0]  %s914_s0, 32, %s22_s26, [#allocation3]  }
  0x1a   :  { %s723_s7 = scalar_lea.vmem %s43_s28, 6144  ;;  %p728_p11 = scmp.lt.s32.totalorder %s43_s28, %s43_s28 }
  0x1b   :  { %p724_p10 = scmp.ne.s32.totalorder %s43_s28, %s723_s7  ;;  %p729_p12 = scmp.lt.s32.totalorder %s723_s7, %s723_s7 }
  0x1d   :  { %p730_p13 = por %p729_p12, %p728_p11 }
  0x1f   :  { %p731_p0 = pnand %p730_p13, %p724_p10 }
  0x21   :  { %734 = shalt.err (!%p731_p0)
}
  0x22   :  { %48 = dma.hbm_to_vmem [thread:$0]  %s916_s2, 6144, %s43_s28, [#allocation6], %s784_s21, %s784_s21, %s785_s22  }
  0x23   :  { %775 = dma.done.wait [#allocation3], 32  }
  0x24   :  { %776 = vsyncadd [#allocation3], 4294967264 }
  0x25   :  { %777 = dma.done.wait [#allocation6], 6656  }
  0x26   :  { %778 = vsyncadd [#allocation6], 4294960640  ;;  %v788_v0 = vmov 0.0   ;;  %vm789_vm0 = vmmov 0   ;;  %v64_v1 = vld [vmem:[#allocation5 + $0x18] sm:$0xff]  ;;  %v63_v2 = vld [vmem:[#allocation5 + $0x10] sm:$0xff] }
  0x27   :  { %545 = vmatprep.subr.mxu0 %v788_v0  ;;  %553 = vmatprep.mubr.msk.f32.mxu0 %vm789_vm0, %v788_v0  ;;  %v162_v3 = vld [vmem:[#allocation7 + $0x78] sm:$0xff]  ;;  %v62_v4 = vld [vmem:[#allocation5 + $0x8] sm:$0xff]  ;;  %v161_v5 = vld [vmem:[#allocation7 + $0x70] sm:$0xff]  ;;  %vm72_vm1 = vcmask 261120   ;;  %vm433_vm2 = vcmask 58368   ;;  %s790_s15 = smov 120  }
  0x28   :  { %556 = vmatprep.subr.mxu1 %v788_v0  ;;  %588 = vmatprep.mubr.msk.f32.mxu1 %vm789_vm0, %v788_v0  ;;  %v160_v6 = vld [vmem:[#allocation7 + $0x68] sm:$0xff]  ;;  %v61_v7 = vld [vmem:[#allocation5] sm:$0xff]  ;;  %v60_v8 = vld [vmem:[#allocation2] sm:$0x3] }
  0x29   :  { %546 = vmatpush3.msra.mxu0 %v64_v1  ;;  %557 = vmatpush3.msra.mxu1 %v162_v3  ;;  %v159_v9 = vld [vmem:[#allocation7 + $0x60] sm:$0xff]  ;;  %v158_v10 = vld [vmem:[#allocation7 + $0x58] sm:$0xff]  ;;  %v157_v11 = vld [vmem:[#allocation7 + $0x50] sm:$0xff] }
  0x2a   :  { %547 = vmatprep.subr.mxu0 %v788_v0  ;;  %558 = vmatprep.subr.mxu1 %v788_v0  ;;  %v156_v12 = vld [vmem:[#allocation7 + $0x48] sm:$0xff]  ;;  %v155_v13 = vld [vmem:[#allocation7 + $0x40] sm:$0xff]  ;;  %v154_v14 = vld [vmem:[#allocation7 + $0x38] sm:$0xff] }
  0x2b   :  { %548 = vmatpush3.msra.mxu0 %v63_v2  ;;  %559 = vmatpush3.msra.mxu1 %v161_v5  ;;  %v153_v15 = vld [vmem:[#allocation7 + $0x30] sm:$0xff]  ;;  %v152_v16 = vld [vmem:[#allocation7 + $0x28] sm:$0xff]  ;;  %v151_v17 = vld [vmem:[#allocation7 + $0x20] sm:$0xff] }
  0x2c   :  { %549 = vmatprep.subr.mxu0 %v788_v0  ;;  %560 = vmatprep.subr.mxu1 %v788_v0  ;;  %v150_v18 = vld [vmem:[#allocation7 + $0x18] sm:$0xff]  ;;  %v149_v19 = vld [vmem:[#allocation7 + $0x10] sm:$0xff]  ;;  %v148_v20 = vld [vmem:[#allocation7 + $0x8] sm:$0xff] }
  0x2d   :  { %550 = vmatpush3.msra.mxu0 %v62_v4  ;;  %561 = vmatpush3.msra.mxu1 %v160_v6  ;;  %v147_v21 = vld [vmem:[#allocation7] sm:$0xff]  ;;  %v258_v22 = vld [vmem:[#allocation7 + $0xf8] sm:$0xff]  ;;  %v257_v23 = vld [vmem:[#allocation7 + $0xf0] sm:$0xff] }
  0x2e   :  { %551 = vmatprep.subr.mxu0 %v788_v0  ;;  %562 = vmatprep.subr.mxu1 %v788_v0  ;;  %v256_v24 = vld [vmem:[#allocation7 + $0xe8] sm:$0xff]  ;;  %v255_v25 = vld [vmem:[#allocation7 + $0xe0] sm:$0xff]  ;;  %v254_v26 = vld [vmem:[#allocation7 + $0xd8] sm:$0xff] }
  0x2f   :  { %552 = vmatpush3.msra.mxu0 %v61_v7  ;;  %563 = vmatpush3.msra.mxu1 %v159_v9  ;;  %v253_v27 = vld [vmem:[#allocation7 + $0xd0] sm:$0xff]  ;;  %v252_v28 = vld [vmem:[#allocation7 + $0xc8] sm:$0xff]  ;;  %v251_v29 = vld [vmem:[#allocation7 + $0xc0] sm:$0xff] }
  0x30   :  { %554 = vmatmul.mubr.msk.f32.vlgmr.msra.gmra.mxu0 %vm72_vm1, %v60_v8  ;;  %564 = vmatprep.subr.mxu1 %v788_v0  ;;  %v250_v30 = vld [vmem:[#allocation7 + $0xb8] sm:$0xff]  ;;  %v249_v31 = vld [vmem:[#allocation7 + $0xb0] sm:$0xff]  ;;  %v248_v32 = vld [vmem:[#allocation7 + $0xa8] sm:$0xff] }
  0x31   :  { %591 = vmatprep.subr.mxu0 %v788_v0  ;;  %565 = vmatpush3.msra.mxu1 %v158_v10  ;;  %v247_v33 = vld [vmem:[#allocation7 + $0xa0] sm:$0xff]  ;;  %v246_v34 = vld [vmem:[#allocation7 + $0x98] sm:$0xff]  ;;  %v481_v35 = vld [vmem:[%s917_s3] ss:$0 sm:$0xff] }
  0x32   :  { %623 = vmatprep.mubr.msk.f32.mxu0 %vm789_vm0, %v788_v0  ;;  %566 = vmatprep.subr.mxu1 %v788_v0  ;;  %v245_v40 = vld [vmem:[#allocation7 + $0x90] sm:$0xff]  ;;  %v244_v41 = vld [vmem:[#allocation7 + $0x88] sm:$0xff]  ;;  %v243_v42 = vld [vmem:[#allocation7 + $0x80] sm:$0xff] }
  0x33   :  { %567 = vmatpush3.msra.mxu1 %v157_v11  ;;  %592 = vmatpush3.msra.mxu0 %v258_v22  ;;  %v354_v43 = vld [vmem:[#allocation7 + $0x178] sm:$0xff]  ;;  %v353_v44 = vld [vmem:[#allocation7 + $0x170] sm:$0xff]  ;;  %v352_v45 = vld [vmem:[#allocation7 + $0x168] sm:$0xff] }
  0x34   :  { %568 = vmatprep.subr.mxu1 %v788_v0  ;;  %593 = vmatprep.subr.mxu0 %v788_v0  ;;  %v351_v46 = vld [vmem:[#allocation7 + $0x160] sm:$0xff]  ;;  %v350_v47 = vld [vmem:[#allocation7 + $0x158] sm:$0xff]  ;;  %v349_v48 = vld [vmem:[#allocation7 + $0x150] sm:$0xff] }
  0x35   :  { %569 = vmatpush3.msra.mxu1 %v156_v12  ;;  %594 = vmatpush3.msra.mxu0 %v257_v23  ;;  %v348_v49 = vld [vmem:[#allocation7 + $0x148] sm:$0xff]  ;;  %v347_v50 = vld [vmem:[#allocation7 + $0x140] sm:$0xff]  ;;  %v346_v51 = vld [vmem:[#allocation7 + $0x138] sm:$0xff] }
  0x36   :  { %570 = vmatprep.subr.mxu1 %v788_v0  ;;  %595 = vmatprep.subr.mxu0 %v788_v0  ;;  %v345_v52 = vld [vmem:[#allocation7 + $0x130] sm:$0xff]  ;;  %v344_v53 = vld [vmem:[#allocation7 + $0x128] sm:$0xff]  ;;  %v343_v54 = vld [vmem:[#allocation7 + $0x120] sm:$0xff] }
  0x37   :  { %571 = vmatpush3.msra.mxu1 %v155_v13  ;;  %596 = vmatpush3.msra.mxu0 %v256_v24  ;;  %v342_v55 = vld [vmem:[#allocation7 + $0x118] sm:$0xff]  ;;  %v484_v56 = vld [vmem:[%s917_s3 + $0x1] ss:$0 sm:$0xff]  ;;  %v340_v62 = vld [vmem:[#allocation7 + $0x108] sm:$0xff] }
  0x38   :  { %572 = vmatprep.subr.mxu1 %v788_v0  ;;  %597 = vmatprep.subr.mxu0 %v788_v0  ;;  %v341_v61 = vld [vmem:[#allocation7 + $0x110] sm:$0xff]  ;;  %v339_v63 = vld [vmem:[#allocation7 + $0x100] sm:$0xff]  ;;  %v486_v1 = vld [vmem:[%s917_s3 + $0x2] ss:$0 sm:$0xff] }
  0x39   :  { %573 = vmatpush3.msra.mxu1 %v154_v14  ;;  %598 = vmatpush3.msra.mxu0 %v255_v25  ;;  %v488_v6 = vld [vmem:[%s917_s3 + $0x3] ss:$0 sm:$0xff]  ;;  %s791_s3 = smov [#allocation9]  }
  0x3a   :  { %574 = vmatprep.subr.mxu1 %v788_v0  ;;  %599 = vmatprep.subr.mxu0 %v788_v0  ;;  %s467_s16 = sshll.u32 %s791_s3, 4  ;;  %s468_s16 = int_to_ptr.vmem [resolvable:$true] %s467_s16 }
  0x3b   :  { %575 = vmatpush3.msra.mxu1 %v153_v15  ;;  %600 = vmatpush3.msra.mxu0 %v254_v26  ;;  %s735_s17 = scalar_lea.vmem %s468_s16, 32  ;;  %p740_p2 = scmp.lt.s32.totalorder %s468_s16, %s468_s16 }
  0x3c   :  { %576 = vmatprep.subr.mxu1 %v788_v0  ;;  %601 = vmatprep.subr.mxu0 %v788_v0  ;;  %p736_p1 = scmp.ne.s32.totalorder %s468_s16, %s735_s17  ;;  %p741_p3 = scmp.lt.s32.totalorder %s735_s17, %s735_s17 }
  0x3d   :  { %577 = vmatpush3.msra.mxu1 %v152_v16  ;;  %602 = vmatpush3.msra.mxu0 %v253_v27 }
  0x3e   :  { %578 = vmatprep.subr.mxu1 %v788_v0  ;;  %603 = vmatprep.subr.mxu0 %v788_v0  ;;  %p742_p4 = por %p741_p3, %p740_p2 }
  0x3f   :  { %579 = vmatpush3.msra.mxu1 %v151_v17  ;;  %604 = vmatpush3.msra.mxu0 %v252_v28 }
  0x40   :  { %580 = vmatprep.subr.mxu1 %v788_v0  ;;  %605 = vmatprep.subr.mxu0 %v788_v0  ;;  %p743_p5 = pnand %p742_p4, %p736_p1 }
  0x41   :  { %581 = vmatpush3.msra.mxu1 %v150_v18  ;;  %606 = vmatpush3.msra.mxu0 %v251_v29 }
  0x42   :  { %582 = vmatprep.subr.mxu1 %v788_v0  ;;  %607 = vmatprep.subr.mxu0 %v788_v0 }
  0x43   :  { %583 = vmatpush3.msra.mxu1 %v149_v19  ;;  %608 = vmatpush3.msra.mxu0 %v250_v30 }
  0x44   :  { %584 = vmatprep.subr.mxu1 %v788_v0  ;;  %609 = vmatprep.subr.mxu0 %v788_v0 }
  0x45   :  { %585 = vmatpush3.msra.mxu1 %v148_v20  ;;  %610 = vmatpush3.msra.mxu0 %v249_v31 }
  0x46   :  { %586 = vmatprep.subr.mxu1 %v788_v0  ;;  %611 = vmatprep.subr.mxu0 %v788_v0 }
  0x47   :  { %587 = vmatpush3.msra.mxu1 %v147_v21  ;;  %612 = vmatpush3.msra.mxu0 %v248_v32 }
  0x48   :  { %626 = vmatprep.subr.mxu1 %v788_v0  ;;  %613 = vmatprep.subr.mxu0 %v788_v0 }
  0x49   :  { %614 = vmatpush3.msra.mxu0 %v247_v33 }
  0x4a   :  { %615 = vmatprep.subr.mxu0 %v788_v0 }
  0x4b   :  { %616 = vmatpush3.msra.mxu0 %v246_v34 }
  0x4c   :  { %617 = vmatprep.subr.mxu0 %v788_v0 }
  0x4d   :  { %618 = vmatpush3.msra.mxu0 %v245_v40 }
  0x4e   :  { %619 = vmatprep.subr.mxu0 %v788_v0 }
  0x4f   :  { %620 = vmatpush3.msra.mxu0 %v244_v41 }
  0x50   :  { %621 = vmatprep.subr.mxu0 %v788_v0 }
  0x51   :  { %622 = vmatpush3.msra.mxu0 %v243_v42 }
  0xf0   :  { %v142_v36 = vpop.f32.mrf.mxu0 }
  0xf1   :  { %v143_v37 = vadd.f32 %v481_v35, %v142_v36 }
  0xf2   :  { %v555_v38 = vpop.f32.mrf.mxu0 }
  0xf3   :  { %v146_v39 = vmax.f32 %v143_v37, 0.0 }
  0xf5   :  { %589 = vmatmul.mubr.f32.vlgmr.msra.gmra.mxu1 %v146_v39 }
  0xf6   :  { %658 = vmatprep.mubr.msk.f32.mxu1 %vm789_vm0, %v788_v0  ;;  %627 = vmatpush3.msra.mxu1 %v354_v43 }
  0xf7   :  { %628 = vmatprep.subr.mxu1 %v788_v0 }
  0xf8   :  { %629 = vmatpush3.msra.mxu1 %v353_v44 }
  0xf9   :  { %630 = vmatprep.subr.mxu1 %v788_v0 }
  0xfa   :  { %631 = vmatpush3.msra.mxu1 %v352_v45 }
  0xfb   :  { %632 = vmatprep.subr.mxu1 %v788_v0 }
  0xfc   :  { %633 = vmatpush3.msra.mxu1 %v351_v46 }
  0xfd   :  { %634 = vmatprep.subr.mxu1 %v788_v0 }
  0xfe   :  { %635 = vmatpush3.msra.mxu1 %v350_v47 }
  0xff   :  { %636 = vmatprep.subr.mxu1 %v788_v0 }
 0x100   :  { %637 = vmatpush3.msra.mxu1 %v349_v48 }
 0x101   :  { %638 = vmatprep.subr.mxu1 %v788_v0 }
 0x102   :  { %639 = vmatpush3.msra.mxu1 %v348_v49 }
 0x103   :  { %640 = vmatprep.subr.mxu1 %v788_v0 }
 0x104   :  { %641 = vmatpush3.msra.mxu1 %v347_v50 }
 0x105   :  { %642 = vmatprep.subr.mxu1 %v788_v0 }
 0x106   :  { %643 = vmatpush3.msra.mxu1 %v346_v51 }
 0x107   :  { %644 = vmatprep.subr.mxu1 %v788_v0 }
 0x108   :  { %645 = vmatpush3.msra.mxu1 %v345_v52 }
 0x109   :  { %646 = vmatprep.subr.mxu1 %v788_v0 }
 0x10a   :  { %647 = vmatpush3.msra.mxu1 %v344_v53 }
 0x10b   :  { %648 = vmatprep.subr.mxu1 %v788_v0 }
 0x10c   :  { %649 = vmatpush3.msra.mxu1 %v343_v54 }
 0x10d   :  { %650 = vmatprep.subr.mxu1 %v788_v0 }
 0x10e   :  { %651 = vmatpush3.msra.mxu1 %v342_v55 }
 0x10f   :  { %652 = vmatprep.subr.mxu1 %v788_v0 }
 0x110   :  { %653 = vmatpush3.msra.mxu1 %v341_v61 }
 0x111   :  { %654 = vmatprep.subr.mxu1 %v788_v0 }
 0x112   :  { %655 = vmatpush3.msra.mxu1 %v340_v62 }
 0x113   :  { %656 = vmatprep.subr.mxu1 %v788_v0 }
 0x114   :  { %657 = vmatpush3.msra.mxu1 %v339_v63 }
 0x1b5   :  { %v237_v57 = vpop.f32.mrf.mxu1 }
 0x1b6   :  { %v238_v58 = vadd.f32 %v484_v56, %v237_v57 }
 0x1b7   :  { %v590_v59 = vpop.f32.mrf.mxu1 }
 0x1b8   :  { %v241_v60 = vmax.f32 %v238_v58, 0.0 }
 0x1ba   :  { %624 = vmatmul.mubr.f32.vlgmr.msra.gmra.mxu0 %v241_v60 }
 0x27a   :  { %v333_v2 = vpop.f32.mrf.mxu0 }
 0x27b   :  { %v334_v3 = vadd.f32 %v486_v1, %v333_v2 }
 0x27c   :  { %v625_v4 = vpop.f32.mrf.mxu0 }
 0x27d   :  { %v337_v5 = vmax.f32 %v334_v3, 0.0 }
 0x27f   :  { %659 = vmatmul.mubr.f32.vlgmr.msra.gmra.mxu1 %v337_v5 }
 0x33f   :  { %v429_v7 = vpop.f32.mrf.mxu1 }
 0x340   :  { %v430_v8 = vadd.f32 %v488_v6, %v429_v7 }
 0x341   :  { %v660_v9 = vpop.f32.mrf.mxu1 }
 0x342   :  { %447 = vrot.lane.b32.xlu1 %v430_v8, %s790_s15  ;;  %v434_v0 = vsel %vm433_vm2, %v430_v8, -inf }
 0x343   :  { %435 = vmax.xlane.f32.xlu0 %v434_v0 }
 0x3b4   :  { %v448_v10 = vpop.permute.xlu1 %447 }
 0x3b5   :  { %450 = vst.msk [vmem:[#allocation9] sm:$0x3] %vm433_vm2, %v448_v10 }
 0x3cc   :  { %v436_v11 = vpop.xlane.xlu0 %435 }
 0x3cd   :  { %v437_v12 = vsub.f32 %v430_v8, %v436_v11 }
 0x3cf   :  { %v438_v13 = vmul.f32 1.442695, %v437_v12 }
 0x3d1   :  { %671 = vpow2.f32 %v438_v13 }
 0x3de   :  { %v672_v14 = vpop.eup %671 }
 0x3df   :  { %v440_v15 = vsel %vm433_vm2, %v672_v14, 0.0 }
 0x3e0   :  { %441 = vadd.xlane.f32.xlu0 %v440_v15 }
 0x3e1   :  { %746 = shalt.err (!%p743_p5)
}
 0x3e2   :  { %470 = dma.vmem_to_hbm [thread:$0]  %s468_s16, 32, %s919_s5, [#allocation10]  }
 0x3e3   :  { %s792_s20 = smov [#allocation8]  }
 0x3e4   :  { %s457_s21 = sshll.u32 %s792_s20, 4  ;;  %s458_s21 = int_to_ptr.vmem [resolvable:$true] %s457_s21 }
 0x3e5   :  { %s755_s22 = scalar_lea.vmem %s458_s21, 32  ;;  %p760_p7 = scmp.lt.s32.totalorder %s458_s21, %s458_s21 }
 0x3e6   :  { %p756_p6 = scmp.ne.s32.totalorder %s458_s21, %s755_s22  ;;  %p761_p8 = scmp.lt.s32.totalorder %s755_s22, %s755_s22 }
 0x3e8   :  { %p762_p9 = por %p761_p8, %p760_p7 }
 0x3ea   :  { %p763_p10 = pnand %p762_p9, %p756_p6 }
 0x469   :  { %v442_v16 = vpop.xlane.xlu0 %441 }
 0x46a   :  { %673 = vrcp.f32 %v442_v16 }
 0x477   :  { %v674_v17 = vpop.eup %673 }
 0x478   :  { %v444_v18 = vmul.f32 %v674_v17, %v672_v14 }
 0x47a   :  { %445 = vst.msk [vmem:[#allocation8] sm:$0x3] %vm433_vm2, %v444_v18 }
 0x47b   :  { %766 = shalt.err (!%p763_p10)
}
 0x47c   :  { %460 = dma.vmem_to_hbm [thread:$0]  %s458_s21, 32, %s918_s4, [#allocation4]  }
 0x47d   :  { %779 = dma.done.wait [#allocation4], 32  }
 0x47e   :  { %780 = vsyncadd [#allocation4], 4294967264 }
 0x47f   :  { %781 = dma.done.wait [#allocation10], 32  }
 0x480   :  { %782 = vsyncadd [#allocation10], 4294967264 }
 0x481   :  { %477 = vsyncpa [#allocation3], 1 }
 0x482   :  { %478 = vsyncpa [#allocation6], 1 }
 0x483   :  { %479 = vsyncpa [#allocation4], 1 }
 0x484   :  { %480 = vsyncpa [#allocation10], 1 }

</bundles_post_ra>
